<compile_context>
chip_gen: v5e
topology: v5e:2x2
jax: 0.10.0
libtpu: 0.0.40
codegen_flags: <defaults>
</compile_context>

<pallas_src>
import functools

import jax
import jax.numpy as jnp
from jax.experimental import pallas as pl
from jax.experimental.pallas import tpu as pltpu

HIDDEN = 50       # fc1 out features (PyTorch module)
OUT = 1           # fc2 out features
D_PAD = 128       # padded input-feature lanes
H_PAD = 128       # padded hidden lanes
OUT_LANES = 128   # lane-dense output slab width
TB_MAX = 256      # max batch-tile rows per grid step


def _round_up(n, m):
    return ((n + m - 1) // m) * m


def _wine_fc_kernel(*refs, apply_dropout):
    if apply_dropout:
        x_ref, w1_ref, b1_ref, w2_ref, b2_ref, mask_ref, o_ref = refs
    else:
        x_ref, w1_ref, b1_ref, w2_ref, b2_ref, o_ref = refs
        mask_ref = None

    # fc1 (MXU, f32 accumulate) + bias + ReLU
    h = jnp.dot(x_ref[...], w1_ref[...],
                preferred_element_type=jnp.float32) + b1_ref[...]
    h = jnp.maximum(h, 0.0)

    # Dropout (train mode): mask holds 0 or 1/(1-p) -> one VPU multiply.
    if apply_dropout:
        h = h * mask_ref[...]

    # fc2 with N=1: VPU multiply + XLU lane reduction instead of an MXU matmul
    # (avoids wasting 255/256 MXU result lanes and the MRF/MRB round trip).
    y = jnp.sum(h * w2_ref[...], axis=-1, keepdims=True) + b2_ref[...]

    # Lane-dense store: broadcast (tb, 1) across 128 lanes -> unmasked vst.
    o_ref[...] = jnp.broadcast_to(y, o_ref.shape)


def prepare_params(params, input_dim):
    """One-time prep: transpose nn.Linear weights, zero-pad to lane-dense shapes."""
    w1, b1, w2, b2 = params  # torch layouts: (50, D), (50,), (1, 50), (1,)
    w1 = jnp.asarray(w1, jnp.float32)
    b1 = jnp.asarray(b1, jnp.float32)
    w2 = jnp.asarray(w2, jnp.float32)
    b2 = jnp.asarray(b2, jnp.float32)
    w1t = jnp.zeros((D_PAD, H_PAD), jnp.float32).at[:input_dim, :HIDDEN].set(w1.T)
    b1r = jnp.zeros((1, H_PAD), jnp.float32).at[:, :HIDDEN].set(b1[None, :])
    w2r = jnp.zeros((1, H_PAD), jnp.float32).at[:, :HIDDEN].set(w2.reshape(1, HIDDEN))
    b2r = b2.reshape(1, 1)
    return w1t, b1r, w2r, b2r


@functools.partial(jax.jit, static_argnames=("dropout_p", "training"))
def _forward_impl(x, w1t, b1r, w2r, b2r, rng_key, *, dropout_p, training):
    B, D = x.shape
    tb = min(TB_MAX, _round_up(max(B, 1), 8))
    B_pad = _round_up(B, tb)
    grid = (B_pad // tb,)

    x_pad = jnp.zeros((B_pad, D_PAD), jnp.float32).at[:B, :D].set(
        x.astype(jnp.float32))

    apply_dropout = bool(training) and float(dropout_p) > 0.0

    args = [x_pad, w1t, b1r, w2r, b2r]
    in_specs = [
        pl.BlockSpec((tb, D_PAD), lambda i: (i, 0)),      # x: tiled over batch
        pl.BlockSpec((D_PAD, H_PAD), lambda i: (0, 0)),   # w1^T: resident
        pl.BlockSpec((1, H_PAD), lambda i: (0, 0)),       # b1
        pl.BlockSpec((1, H_PAD), lambda i: (0, 0)),       # w2 row
        pl.BlockSpec((1, 1), lambda i: (0, 0)),           # b2
    ]
    if apply_dropout:
        # Inverted-dropout mask generated host/XLA-side (TPU hardware PRNG has
        # no interpret-mode lowering).  Bernoulli keep w.p. (1-p), scaled.
        keep = jax.random.bernoulli(rng_key, 1.0 - dropout_p, (B_pad, H_PAD))
        mask = keep.astype(jnp.float32) * (1.0 / (1.0 - dropout_p))
        args.append(mask)
        in_specs.append(pl.BlockSpec((tb, H_PAD), lambda i: (i, 0)))

    out_pad = pl.pallas_call(
        functools.partial(_wine_fc_kernel, apply_dropout=apply_dropout),
        out_shape=jax.ShapeDtypeStruct((B_pad, OUT_LANES), jnp.float32),
        grid=grid,
        in_specs=in_specs,
        out_specs=pl.BlockSpec((tb, OUT_LANES), lambda i: (i, 0)),
        compiler_params=pltpu.CompilerParams(
            dimension_semantics=("parallel",)),
    )(*args)
    return out_pad[:B, :OUT]


def wine_fc_forward(x, prepped_params, *, dropout_p, training=False,
                    rng_key=None):
    """Wine_FC forward.  x: (B, input_dim) -> (B, 1) float32."""
    if rng_key is None:
        rng_key = jax.random.PRNGKey(0)
    w1t, b1r, w2r, b2r = prepped_params
    return _forward_impl(x, w1t, b1r, w2r, b2r, rng_key,
                         dropout_p=float(dropout_p), training=bool(training))


def init_params(key, input_dim):
    """Deterministic init matching nn.Linear default U(-1/sqrt(fan_in), +)."""
    k1, k2, k3, k4 = jax.random.split(key, 4)
    lim1 = 1.0 / (input_dim ** 0.5)
    lim2 = 1.0 / (HIDDEN ** 0.5)
    w1 = jax.random.uniform(k1, (HIDDEN, input_dim), jnp.float32, -lim1, lim1)
    b1 = jax.random.uniform(k2, (HIDDEN,), jnp.float32, -lim1, lim1)
    w2 = jax.random.uniform(k3, (OUT, HIDDEN), jnp.float32, -lim2, lim2)
    b2 = jax.random.uniform(k4, (OUT,), jnp.float32, -lim2, lim2)
    return w1, b1, w2, b2


if __name__ == "__main__":
    key = jax.random.PRNGKey(0)
    kx, kp, kd = jax.random.split(key, 3)

    batch, input_dim = 8, 11          # wine dataset: 11 features
    dropout_prop = 0.5

    x = jax.random.normal(kx, (batch, input_dim), jnp.float32)
    params = init_params(kp, input_dim)
    prepped = prepare_params(params, input_dim)   # one-time prep (hoisted)

    # eval-mode forward (dropout = identity)
    y_eval = wine_fc_forward(x, prepped, dropout_p=dropout_prop, training=False)
    jax.block_until_ready(y_eval)

    # training-mode forward (inverted dropout)
    y_train = wine_fc_forward(x, prepped, dropout_p=dropout_prop,
                              training=True, rng_key=kd)
    jax.block_until_ready(y_train)

    # sanity: eval path matches plain-JAX reference
    w1, b1, w2, b2 = params
    ref = jnp.maximum(x @ w1.T + b1, 0.0) @ w2.T + b2
    assert y_eval.shape == (batch, OUT)
    assert y_train.shape == (batch, OUT)
    assert jnp.allclose(y_eval, ref, atol=1e-5, rtol=1e-5)
    assert bool(jnp.all(jnp.isfinite(y_train)))

    # training with p=0 must reduce exactly to the eval path
    y_p0 = wine_fc_forward(x, prepped, dropout_p=0.0, training=True)
    assert jnp.allclose(y_p0, y_eval, atol=1e-6, rtol=1e-6)

    print("KERNEL_OK")
</pallas_src>

<mosaic_0001>
module attributes {stable_mosaic.version = 11 : i64} {
  func.func @_wine_fc_kernel(%arg0: i32, %arg1: memref<8x128xf32, #tpu.memory_space<vmem>>, %arg2: memref<128x128xf32, #tpu.memory_space<vmem>>, %arg3: memref<1x128xf32, #tpu.memory_space<vmem>>, %arg4: memref<1x128xf32, #tpu.memory_space<vmem>>, %arg5: memref<1x1xf32, #tpu.memory_space<vmem>>, %arg6: memref<8x128xf32, #tpu.memory_space<vmem>>) attributes {dimension_semantics = [#tpu.dimension_semantics<parallel>], iteration_bounds = array<i64: 1>, scalar_prefetch = 0 : i64, scratch_operands = 0 : i64, tpu.core_type = #tpu.core_type<tc>, window_params = [{transform_indices = @transform_0, window_bounds = array<i64: 8, 128>}, {pipeline_mode = #tpu.pipeline_mode<synchronous>, transform_indices = @transform_1, window_bounds = array<i64: 128, 128>}, {pipeline_mode = #tpu.pipeline_mode<synchronous>, transform_indices = @transform_2, window_bounds = array<i64: 1, 128>}, {pipeline_mode = #tpu.pipeline_mode<synchronous>, transform_indices = @transform_3, window_bounds = array<i64: 1, 128>}, {pipeline_mode = #tpu.pipeline_mode<synchronous>, transform_indices = @transform_4, window_bounds = array<i64: 1, 1>}, {transform_indices = @transform_5, window_bounds = array<i64: 8, 128>}]} {
    %c0 = arith.constant 0 : index
    %c0_0 = arith.constant 0 : index
    %0 = vector.load %arg1[%c0, %c0_0] : memref<8x128xf32, #tpu.memory_space<vmem>>, vector<8x128xf32>
    %c0_1 = arith.constant 0 : index
    %c0_2 = arith.constant 0 : index
    %1 = vector.load %arg2[%c0_1, %c0_2] : memref<128x128xf32, #tpu.memory_space<vmem>>, vector<128x128xf32>
    %cst = arith.constant dense<0.000000e+00> : vector<8x128xf32>
    %2 = tpu.matmul %0, %1, %cst {dimension_numbers = #tpu.dot_dimension_numbers<[1], [0], [0], [1], [0, 0, 1, 1], [], []>} : vector<8x128xf32>, vector<128x128xf32>, vector<8x128xf32> -> vector<8x128xf32>
    %c0_3 = arith.constant 0 : index
    %c0_4 = arith.constant 0 : index
    %3 = vector.load %arg3[%c0_3, %c0_4] : memref<1x128xf32, #tpu.memory_space<vmem>>, vector<1x128xf32>
    %4 = vector.broadcast %3 : vector<1x128xf32> to vector<8x128xf32>
    %5 = arith.addf %2, %4 : vector<8x128xf32>
    %cst_5 = arith.constant 0.000000e+00 : f32
    %6 = vector.broadcast %cst_5 : f32 to vector<8x128xf32>
    %7 = arith.maximumf %5, %6 : vector<8x128xf32>
    %c0_6 = arith.constant 0 : index
    %c0_7 = arith.constant 0 : index
    %8 = vector.load %arg4[%c0_6, %c0_7] : memref<1x128xf32, #tpu.memory_space<vmem>>, vector<1x128xf32>
    %9 = vector.broadcast %8 : vector<1x128xf32> to vector<8x128xf32>
    %10 = arith.mulf %7, %9 : vector<8x128xf32>
    %cst_8 = arith.constant dense<0.000000e+00> : vector<8xf32>
    %11 = vector.multi_reduction <add>, %10, %cst_8 [1] : vector<8x128xf32> to vector<8xf32>
    %12 = vector.shape_cast %11 : vector<8xf32> to vector<8x1xf32>
    %c0_9 = arith.constant 0 : index
    %c0_10 = arith.constant 0 : index
    %13 = vector.load %arg5[%c0_9, %c0_10] : memref<1x1xf32, #tpu.memory_space<vmem>>, vector<1x1xf32>
    %14 = vector.broadcast %13 : vector<1x1xf32> to vector<8x1xf32>
    %15 = arith.addf %12, %14 : vector<8x1xf32>
    %16 = vector.shape_cast %15 : vector<8x1xf32> to vector<8x1xf32>
    %17 = vector.broadcast %16 : vector<8x1xf32> to vector<8x128xf32>
    %c0_11 = arith.constant 0 : index
    %c0_12 = arith.constant 0 : index
    %18 = vector.load %arg6[%c0_11, %c0_12] : memref<8x128xf32, #tpu.memory_space<vmem>>, vector<8x128xf32>
    tpu.vector_store %arg6[%c0_11, %c0_12], %17 {strides = array<i32>} : memref<8x128xf32, #tpu.memory_space<vmem>>, vector<8x128xf32>,
    return
  }
  func.func @transform_0(%arg0: i32) -> (i32, i32) {
    %c0_i32 = arith.constant 0 : i32
    %c0_i32_0 = arith.constant 0 : i32
    return %arg0, %c0_i32 : i32, i32
  }
  func.func @transform_1(%arg0: i32) -> (i32, i32) {
    %c0_i32 = arith.constant 0 : i32
    %c0_i32_0 = arith.constant 0 : i32
    %c0_i32_1 = arith.constant 0 : i32
    return %c0_i32, %c0_i32_0 : i32, i32
  }
  func.func @transform_2(%arg0: i32) -> (i32, i32) {
    %c0_i32 = arith.constant 0 : i32
    %c0_i32_0 = arith.constant 0 : i32
    %c0_i32_1 = arith.constant 0 : i32
    return %c0_i32, %c0_i32_0 : i32, i32
  }
  func.func @transform_3(%arg0: i32) -> (i32, i32) {
    %c0_i32 = arith.constant 0 : i32
    %c0_i32_0 = arith.constant 0 : i32
    %c0_i32_1 = arith.constant 0 : i32
    return %c0_i32, %c0_i32_0 : i32, i32
  }
  func.func @transform_4(%arg0: i32) -> (i32, i32) {
    %c0_i32 = arith.constant 0 : i32
    %c0_i32_0 = arith.constant 0 : i32
    %c0_i32_1 = arith.constant 0 : i32
    return %c0_i32, %c0_i32_0 : i32, i32
  }
  func.func @transform_5(%arg0: i32) -> (i32, i32) {
    %c0_i32 = arith.constant 0 : i32
    %c0_i32_0 = arith.constant 0 : i32
    return %arg0, %c0_i32 : i32, i32
  }
}

</mosaic_0001>

<bundles_post_ra>
// kernel: _forward_impl.1
= control target key start
LH: loop header
LB: loop body
LE: loop exit
PB: predicated region body
PF: predicated region fallthrough
CT: control target
= control target key end

     0   :  { %s189_s0 = inlined_call_operand.vmem [shape: f32[8,128], index: 0, kind: input, shape index: {}]   ;;  %s190_s1 = inlined_call_operand.hbm [shape: f32[128,128], index: 1, kind: input, shape index: {}]   ;;  %s191_s2 = inlined_call_operand.vmem [shape: f32[1,128], index: 2, kind: input, shape index: {}]   ;;  %s192_s3 = inlined_call_operand.vmem [shape: f32[1,128], index: 3, kind: input, shape index: {}]   ;;  %s193_s4 = inlined_call_operand.<no memory space> [shape: f32[1,1], index: 4, kind: input, shape index: {}]   ;;  %s194_s5 = inlined_call_operand.vmem [shape: f32[8,128], index: 5, kind: output, shape index: {}]  }
   0x1   :  { %v10_v0 = vstv %s193_s4 }
   0x2   :  { %11 = vst [vmem:[#allocation2] sm:$0x1] %v10_v0 }
   0x3   :  { %12 = vsyncpa [#allocation4], 0  ;;  %s19_s22 = sshll.u32 %s190_s1, 4  ;;  %s137_s23 = smov [#allocation3]   ;;  %s20_s22 = int_to_ptr.hbm [resolvable:$true] %s19_s22 }
   0x4   :  { %s21_s24 = sshll.u32 %s137_s23, 4  ;;  %s138_s25 = smov 128   ;;  %s22_s24 = int_to_ptr.vmem [resolvable:$true] %s21_s24 }
   0x5   :  { %s139_s26 = smov 8  }
   0x6   :  { %27 = dma.hbm_to_vmem [thread:$0]  %s20_s22, 2048, %s22_s24, [#allocation4], %s138_s25, %s138_s25, %s139_s26  }
   0x7   :  { %135 = dma.done.wait [#allocation4], 2048  }
   0x8   :  { %136 = vsyncadd [#allocation4], 4294965248  ;;  %v54_v1 = vld [vmem:[#allocation3 + $0x78] sm:$0xff]  ;;  %v53_v2 = vld [vmem:[#allocation3 + $0x70] sm:$0xff]  ;;  %v140_v24 = vmov 0  }
   0x9   :  { %59 = vmatpush.msra.mxu0 %v54_v1  ;;  %v52_v3 = vld [vmem:[#allocation3 + $0x68] sm:$0xff]  ;;  %v51_v4 = vld [vmem:[#allocation3 + $0x60] sm:$0xff]  ;;  %v50_v5 = vld [vmem:[#allocation3 + $0x58] sm:$0xff]  ;;  %107 = vset.pattern.permute.xlu0 %v140_v24 }
   0xa   :  { %v49_v6 = vld [vmem:[#allocation3 + $0x50] sm:$0xff]  ;;  %v48_v7 = vld [vmem:[#allocation3 + $0x48] sm:$0xff]  ;;  %v47_v8 = vld [vmem:[#allocation3 + $0x40] sm:$0xff] }
   0xb   :  { %60 = vmatpush.msra.mxu0 %v53_v2  ;;  %v46_v9 = vld [vmem:[#allocation3 + $0x38] sm:$0xff]  ;;  %v45_v10 = vld [vmem:[#allocation3 + $0x30] sm:$0xff]  ;;  %v44_v11 = vld [vmem:[#allocation3 + $0x28] sm:$0xff] }
   0xc   :  { %v43_v12 = vld [vmem:[#allocation3 + $0x20] sm:$0xff]  ;;  %v42_v13 = vld [vmem:[#allocation3 + $0x18] sm:$0xff]  ;;  %v41_v14 = vld [vmem:[#allocation3 + $0x10] sm:$0xff] }
   0xd   :  { %61 = vmatpush.msra.mxu0 %v52_v3  ;;  %v40_v15 = vld [vmem:[#allocation3 + $0x8] sm:$0xff]  ;;  %v39_v16 = vld [vmem:[#allocation3] sm:$0xff]  ;;  %v108_v18 = vld [vmem:[%s191_s2] ss:$0 sm:$0xff] }
   0xe   :  { %v38_v17 = vld [vmem:[%s189_s0] sm:$0xff] }
   0xf   :  { %62 = vmatpush.msra.mxu0 %v51_v4  ;;  %v109_v21 = vld [vmem:[%s192_s3] ss:$0 sm:$0xff] }
  0x10   :  { %v110_v25 = vld [vmem:[#allocation2] ss:$0 sm:$0xff] }
  0x11   :  { %63 = vmatpush.msra.mxu0 %v50_v5 }
  0x13   :  { %64 = vmatpush.msra.mxu0 %v49_v6 }
  0x15   :  { %65 = vmatpush.msra.mxu0 %v48_v7 }
  0x17   :  { %66 = vmatpush.msra.mxu0 %v47_v8 }
  0x19   :  { %67 = vmatpush.msra.mxu0 %v46_v9 }
  0x1b   :  { %68 = vmatpush.msra.mxu0 %v45_v10 }
  0x1d   :  { %69 = vmatpush.msra.mxu0 %v44_v11 }
  0x1f   :  { %70 = vmatpush.msra.mxu0 %v43_v12 }
  0x21   :  { %71 = vmatpush.msra.mxu0 %v42_v13 }
  0x23   :  { %72 = vmatpush.msra.mxu0 %v41_v14 }
  0x25   :  { %73 = vmatpush.msra.mxu0 %v40_v15 }
  0x27   :  { %74 = vmatpush.msra.mxu0 %v39_v16 }
  0x28   :  { %75 = vmatmul.f32.vlgmr.msra.gmra.mxu0 %v38_v17 }
  0xa5   :  { %v76_v19 = vpop.f32.mrf.mxu0 }
  0xa6   :  { %v77_v20 = vadd.f32 %v108_v18, %v76_v19 }
  0xa8   :  { %v79_v22 = vmax.f32 %v77_v20, 0.0 }
  0xaa   :  { %v84_v23 = vmul.f32 %v109_v21, %v79_v22 }
  0xac   :  { %85 = vadd.xlane.f32.xlu0 %v84_v23 }
 0x11f   :  { %v86_v26 = vpop.xlane.xlu0 %85 }
 0x120   :  { %v91_v27 = vadd.f32 %v110_v25, %v86_v26 }
 0x122   :  { %94 = vperm.xlu0 %107, %v91_v27  }
 0x194   :  { %v95_v28 = vpop.permute.xlu0 %94 }
 0x195   :  { %97 = vst [vmem:[%s194_s5] sm:$0xff] %v95_v28 }
 0x196   :  { %102 = vsyncpa [#allocation4], 1 }

</bundles_post_ra>
